<compile_context>
chip_gen: v7x
topology: tpu7x:2x2x1
jax: 0.10.0
libtpu: 0.0.40
codegen_flags: <defaults>
</compile_context>

<pallas_src>
import jax
import jax.numpy as jnp
from jax.experimental import pallas as pl
from jax.experimental.pallas import tpu as pltpu


def _round_up(n, m):
    return ((n + m - 1) // m) * m


def _pick_tk(fp, block_k):
    """Largest multiple of 128 that divides fp and is <= block_k."""
    units = fp // 128
    target = max(1, min(units, _round_up(max(block_k, 128), 128) // 128))
    best = 1
    for c in range(1, units + 1):
        if units % c == 0 and c <= target:
            best = c
    return best * 128


def affine_kernel(x_ref, y_ref, bw_ref, rbb_ref, r_ref, out_ref):
    """grid = (batch tiles [parallel], K reduction tiles [arbitrary])."""
    k = pl.program_id(1)
    nk = pl.num_programs(1)

    # beta partial-sum for this K slice: (tb, tk) @ (tk, Fp) -> f32.
    partial = jnp.dot(y_ref[...], bw_ref[...],
                      preferred_element_type=jnp.float32)

    # Accumulate directly into the resident f32 output block (no scratch).
    @pl.when(k == 0)
    def _():
        out_ref[...] = partial

    @pl.when(k > 0)
    def _():
        out_ref[...] += partial

    @pl.when(k == nk - 1)
    def _():
        # x + r*beta + r*bias  (r*bias precomputed in wrapper; r from SMEM).
        xb = x_ref[...] + r_ref[0] * out_ref[...] + rbb_ref[...]
        sumsq = jnp.sum(xb * xb, axis=1, keepdims=True)
        # F.normalize(dim=1, eps=1e-12): x / max(||x||, 1e-12)
        #   == x * rsqrt(max(sumsq, 1e-24))   (rsqrt -> EUP slot)
        inv = jax.lax.rsqrt(jnp.maximum(sumsq, 1e-24))
        out_ref[...] = (xb * inv).astype(out_ref.dtype)


def affine_forward(x, y, params, r=1.0, *, block_b=256, block_k=512,
                   weight_dtype=jnp.bfloat16,
                   resident_weight_bytes=20 * 1024 * 1024):
    """Pallas TPU forward of Affine.

    x, y: [B, F] float32.  params: {'bw': [F, F] (in, out), 'bb': [1, F]}.
    The fc_gamma branch of the reference is dead code (result unused) and is
    intentionally omitted.
    """
    B, F = x.shape
    assert y.shape == (B, F)

    wd = jnp.dtype(weight_dtype)
    bw_in = params["bw"].astype(wd)          # MXU operand dtype only
    y_in = y.astype(wd)
    # r folded into the tiny bias only (NOT into the FxF weight); r itself is
    # applied to the matmul result inside the kernel via an SMEM scalar.
    rbb = params["bb"].astype(jnp.float32) * jnp.float32(r)
    r_arr = jnp.full((1,), r, dtype=jnp.float32)

    # Lane/sublane friendly tiling.
    Fp = _round_up(F, 128)
    Bp0 = _round_up(B, 8)
    tb = _round_up(min(block_b, Bp0), 8)
    if Bp0 >= 16:
        # keep >= 2 batch tiles so v7x's second TensorCore has work
        tb = min(tb, max(8, (Bp0 // 2) // 8 * 8))
    Bp = _round_up(Bp0, tb)

    bw_bytes = wd.itemsize
    if 2 * Fp * Fp * bw_bytes <= resident_weight_bytes:
        tk = Fp          # whole weight VMEM-resident: DMA'd from HBM once
    else:
        tk = _pick_tk(Fp, block_k)   # divisor of Fp -> no K over-padding
    nk = Fp // tk

    def pad2(a, rows, cols):
        pr, pc = rows - a.shape[0], cols - a.shape[1]
        if pr == 0 and pc == 0:
            return a                 # skip pad copy for aligned shapes
        return jnp.pad(a, ((0, pr), (0, pc)))

    xp = pad2(x.astype(jnp.float32), Bp, Fp)
    yp = pad2(y_in, Bp, Fp)
    bwp = pad2(bw_in, Fp, Fp)
    rbbp = pad2(rbb, 1, Fp)

    y_bytes = jnp.dtype(y_in.dtype).itemsize

    # VMEM working set (double-buffered blocks) -> explicit scoped limit with
    # headroom, capped at v7x's 64 MiB physical VMEM.
    est = (2 * tb * Fp * 4            # x blocks
           + 2 * tb * tk * y_bytes    # y blocks
           + 2 * tk * Fp * bw_bytes   # weight blocks
           + 2 * tb * Fp * 4          # out blocks (accumulator)
           + 2 * Fp * 4)              # r*bias
    vmem_limit = int(min(max(int(est * 1.3), 32 * 1024 * 1024),
                         64 * 1024 * 1024))

    # Weight is re-fetched once per batch tile only when K is actually tiled;
    # with tk == Fp its block index never changes -> fetched exactly once.
    n_bw_fetch = 1 if nk == 1 else (Bp // tb)
    cost = pl.CostEstimate(
        flops=2 * Bp * Fp * Fp + 6 * Bp * Fp,
        transcendentals=Bp,
        bytes_accessed=int(Bp * Fp * 4                 # x read
                           + Bp * Fp * 4               # out write
                           + Bp * Fp * y_bytes         # y read
                           + n_bw_fetch * Fp * Fp * bw_bytes
                           + Fp * 4),
    )

    out = pl.pallas_call(
        affine_kernel,
        out_shape=jax.ShapeDtypeStruct((Bp, Fp), jnp.float32),
        grid_spec=pltpu.PrefetchScalarGridSpec(
            num_scalar_prefetch=0,
            grid=(Bp // tb, nk),
            in_specs=[
                pl.BlockSpec((tb, Fp), lambda i, k: (i, 0)),   # x (resident over k)
                pl.BlockSpec((tb, tk), lambda i, k: (i, k)),   # y
                pl.BlockSpec((tk, Fp), lambda i, k: (k, 0)),   # bw (in, out)
                pl.BlockSpec((1, Fp), lambda i, k: (0, 0)),    # r * bias
                pl.BlockSpec(memory_space=pltpu.MemorySpace.SMEM),  # r scalar
            ],
            out_specs=pl.BlockSpec((tb, Fp), lambda i, k: (i, 0)),
        ),
        compiler_params=pltpu.CompilerParams(
            dimension_semantics=("parallel", "arbitrary"),
            vmem_limit_bytes=vmem_limit),
        input_output_aliases={0: 0},   # reuse (padded) x HBM buffer for out
        cost_estimate=cost,
    )(xp, yp, bwp, rbbp, r_arr)

    if Bp != B or Fp != F:
        out = out[:B, :F]
    return out


def affine_reference(x, y, params, r=1.0):
    beta = y @ params["bw"] + params["bb"]
    xx = x + r * beta
    norm = jnp.sqrt(jnp.sum(xx * xx, axis=1, keepdims=True))
    return xx / jnp.maximum(norm, 1e-12)


if __name__ == "__main__":
    # NOTE: shapes this small are below the point where a hand kernel pays off
    # (XLA fusion wins); they are kept small purely as a correctness check.
    key = jax.random.PRNGKey(0)

    # --- test 1: toy shape, single tile, f32, weight-resident path.
    # Non-zero bw/bb so the matmul path is exercised (the PyTorch init zeros
    # them -> beta == 0).
    B, F = 8, 32
    kx, ky, kw, kb = jax.random.split(key, 4)
    x = jax.random.normal(kx, (B, F), jnp.float32)
    y = jax.random.normal(ky, (B, F), jnp.float32)
    bound = 1.0 / (F ** 0.5)
    params = {
        "bw": jax.random.uniform(kw, (F, F), jnp.float32, -bound, bound),
        "bb": jax.random.uniform(kb, (1, F), jnp.float32, -bound, bound),
    }
    out = jax.block_until_ready(
        affine_forward(x, y, params, r=0.7, weight_dtype=jnp.float32))
    ref = affine_reference(x, y, params, r=0.7)
    assert jnp.allclose(out, ref, atol=1e-4, rtol=1e-4), "f32 single-tile mismatch"

    # --- test 2: feature padding (160 -> 256 lanes), forced K tiling
    # (resident budget 0) and 3 batch tiles x 2 K tiles to exercise the
    # accumulate-into-out logic across i transitions, f32.
    B2, F2 = 24, 160
    k1, k2, k3, k4 = jax.random.split(jax.random.PRNGKey(1), 4)
    x2 = jax.random.normal(k1, (B2, F2), jnp.float32)
    y2 = jax.random.normal(k2, (B2, F2), jnp.float32)
    b2 = 1.0 / (F2 ** 0.5)
    params2 = {
        "bw": jax.random.uniform(k3, (F2, F2), jnp.float32, -b2, b2),
        "bb": jax.random.uniform(k4, (1, F2), jnp.float32, -b2, b2),
    }
    out2 = jax.block_until_ready(
        affine_forward(x2, y2, params2, r=1.3, block_b=8, block_k=128,
                       weight_dtype=jnp.float32, resident_weight_bytes=0))
    ref2 = affine_reference(x2, y2, params2, r=1.3)
    assert jnp.allclose(out2, ref2, atol=1e-4, rtol=1e-4), "f32 tiled mismatch"

    # --- test 3: default bf16 streaming of y / bw (f32 MXU accumulation,
    # f32 tail), compared against a reference using the same bf16 operands
    # with r applied after the matmul (as the kernel does).
    out3 = jax.block_until_ready(
        affine_forward(x2, y2, params2, r=1.3, block_b=8, block_k=128,
                       resident_weight_bytes=0))   # weight_dtype=bf16 default
    beta_bf = jnp.dot(y2.astype(jnp.bfloat16), params2["bw"].astype(jnp.bfloat16),
                      preferred_element_type=jnp.float32)
    xx3 = x2 + 1.3 * beta_bf + 1.3 * params2["bb"]
    ref3 = xx3 / jnp.maximum(
        jnp.sqrt(jnp.sum(xx3 * xx3, axis=1, keepdims=True)), 1e-12)
    assert jnp.allclose(out3, ref3, atol=3e-3, rtol=3e-3), "bf16 mismatch"

    # --- test 4: actual PyTorch initialization (zero beta weights/bias):
    # forward reduces to L2-normalizing x (fc_gamma output unused).
    params_init = {"bw": jnp.zeros((F, F), jnp.float32),
                   "bb": jnp.zeros((1, F), jnp.float32)}
    out4 = jax.block_until_ready(
        affine_forward(x, y, params_init, r=1.0, weight_dtype=jnp.float32))
    ref4 = x / jnp.maximum(
        jnp.sqrt(jnp.sum(x * x, axis=1, keepdims=True)), 1e-12)
    assert jnp.allclose(out4, ref4, atol=1e-5, rtol=1e-5), "init-state mismatch"

    print("KERNEL_OK")
</pallas_src>

<mosaic_0001>
module attributes {stable_mosaic.version = 11 : i64} {
  func.func @affine_kernel(%arg0: i32, %arg1: i32, %arg2: memref<8x128xf32, #tpu.memory_space<vmem>>, %arg3: memref<8x128xf32, #tpu.memory_space<vmem>>, %arg4: memref<128x128xf32, #tpu.memory_space<vmem>>, %arg5: memref<1x128xf32, #tpu.memory_space<vmem>>, %arg6: memref<1xf32, #tpu.memory_space<smem>>, %arg7: memref<8x128xf32, #tpu.memory_space<vmem>>) attributes {dimension_semantics = [#tpu.dimension_semantics<parallel>, #tpu.dimension_semantics<arbitrary>], iteration_bounds = array<i64: 1, 1>, scalar_prefetch = 0 : i64, scratch_operands = 0 : i64, tpu.core_type = #tpu.core_type<tc>, window_params = [{transform_indices = @transform_0, window_bounds = array<i64: 8, 128>}, {transform_indices = @transform_1, window_bounds = array<i64: 8, 128>}, {transform_indices = @transform_2, window_bounds = array<i64: 128, 128>}, {pipeline_mode = #tpu.pipeline_mode<synchronous>, transform_indices = @transform_3, window_bounds = array<i64: 1, 128>}, {transform_indices = @transform_4, window_bounds = array<i64: 1>}, {transform_indices = @transform_5, window_bounds = array<i64: 8, 128>}]} {
    %c0 = arith.constant 0 : index
    %c0_0 = arith.constant 0 : index
    %0 = vector.load %arg3[%c0, %c0_0] : memref<8x128xf32, #tpu.memory_space<vmem>>, vector<8x128xf32>
    %c0_1 = arith.constant 0 : index
    %c0_2 = arith.constant 0 : index
    %1 = vector.load %arg4[%c0_1, %c0_2] : memref<128x128xf32, #tpu.memory_space<vmem>>, vector<128x128xf32>
    %cst = arith.constant dense<0.000000e+00> : vector<8x128xf32>
    %2 = tpu.matmul %0, %1, %cst {dimension_numbers = #tpu.dot_dimension_numbers<[1], [0], [0], [1], [0, 0, 1, 1], [], []>} : vector<8x128xf32>, vector<128x128xf32>, vector<8x128xf32> -> vector<8x128xf32>
    %c0_i32 = arith.constant 0 : i32
    %3 = arith.cmpi eq, %arg1, %c0_i32 : i32
    %4 = arith.extui %3 : i1 to i32
    %c0_i32_3 = arith.constant 0 : i32
    %5 = arith.cmpi ne, %4, %c0_i32_3 : i32
    scf.if %5 {
      %c0_8 = arith.constant 0 : index
      %c0_9 = arith.constant 0 : index
      %12 = vector.load %arg7[%c0_8, %c0_9] : memref<8x128xf32, #tpu.memory_space<vmem>>, vector<8x128xf32>
      tpu.vector_store %arg7[%c0_8, %c0_9], %2 {strides = array<i32>} : memref<8x128xf32, #tpu.memory_space<vmem>>, vector<8x128xf32>,
    } else {
    }
    %c0_i32_4 = arith.constant 0 : i32
    %6 = arith.cmpi sgt, %arg1, %c0_i32_4 : i32
    %7 = arith.extui %6 : i1 to i32
    %c0_i32_5 = arith.constant 0 : i32
    %8 = arith.cmpi ne, %7, %c0_i32_5 : i32
    scf.if %8 {
      %c0_8 = arith.constant 0 : index
      %c0_9 = arith.constant 0 : index
      %12 = vector.load %arg7[%c0_8, %c0_9] : memref<8x128xf32, #tpu.memory_space<vmem>>, vector<8x128xf32>
      %13 = arith.addf %12, %2 : vector<8x128xf32>
      %c0_10 = arith.constant 0 : index
      %c0_11 = arith.constant 0 : index
      %14 = vector.load %arg7[%c0_10, %c0_11] : memref<8x128xf32, #tpu.memory_space<vmem>>, vector<8x128xf32>
      tpu.vector_store %arg7[%c0_10, %c0_11], %13 {strides = array<i32>} : memref<8x128xf32, #tpu.memory_space<vmem>>, vector<8x128xf32>,
    } else {
    }
    %c0_i32_6 = arith.constant 0 : i32
    %9 = arith.cmpi eq, %arg1, %c0_i32_6 : i32
    %10 = arith.extui %9 : i1 to i32
    %c0_i32_7 = arith.constant 0 : i32
    %11 = arith.cmpi ne, %10, %c0_i32_7 : i32
    scf.if %11 {
      %c0_8 = arith.constant 0 : index
      %c0_9 = arith.constant 0 : index
      %12 = vector.load %arg2[%c0_8, %c0_9] : memref<8x128xf32, #tpu.memory_space<vmem>>, vector<8x128xf32>
      %c0_10 = arith.constant 0 : index
      %13 = memref.load %arg6[%c0_10] : memref<1xf32, #tpu.memory_space<smem>>
      %c0_11 = arith.constant 0 : index
      %c0_12 = arith.constant 0 : index
      %14 = vector.load %arg7[%c0_11, %c0_12] : memref<8x128xf32, #tpu.memory_space<vmem>>, vector<8x128xf32>
      %15 = vector.broadcast %13 : f32 to vector<8x128xf32>
      %16 = arith.mulf %15, %14 : vector<8x128xf32>
      %17 = arith.addf %12, %16 : vector<8x128xf32>
      %c0_13 = arith.constant 0 : index
      %c0_14 = arith.constant 0 : index
      %18 = vector.load %arg5[%c0_13, %c0_14] : memref<1x128xf32, #tpu.memory_space<vmem>>, vector<1x128xf32>
      %19 = vector.broadcast %18 : vector<1x128xf32> to vector<8x128xf32>
      %20 = arith.addf %17, %19 : vector<8x128xf32>
      %21 = arith.mulf %20, %20 : vector<8x128xf32>
      %cst_15 = arith.constant dense<0.000000e+00> : vector<8xf32>
      %22 = vector.multi_reduction <add>, %21, %cst_15 [1] : vector<8x128xf32> to vector<8xf32>
      %23 = vector.shape_cast %22 : vector<8xf32> to vector<8x1xf32>
      %cst_16 = arith.constant 1.000000e-24 : f32
      %24 = vector.broadcast %cst_16 : f32 to vector<8x1xf32>
      %25 = arith.maximumf %23, %24 : vector<8x1xf32>
      %26 = math.rsqrt %25 : vector<8x1xf32>
      %27 = vector.broadcast %26 : vector<8x1xf32> to vector<8x128xf32>
      %28 = arith.mulf %20, %27 : vector<8x128xf32>
      %c0_17 = arith.constant 0 : index
      %c0_18 = arith.constant 0 : index
      %29 = vector.load %arg7[%c0_17, %c0_18] : memref<8x128xf32, #tpu.memory_space<vmem>>, vector<8x128xf32>
      tpu.vector_store %arg7[%c0_17, %c0_18], %28 {strides = array<i32>} : memref<8x128xf32, #tpu.memory_space<vmem>>, vector<8x128xf32>,
    } else {
    }
    return
  }
  func.func @transform_0(%arg0: i32, %arg1: i32) -> (i32, i32) {
    %c0_i32 = arith.constant 0 : i32
    %c0_i32_0 = arith.constant 0 : i32
    return %arg0, %c0_i32 : i32, i32
  }
  func.func @transform_1(%arg0: i32, %arg1: i32) -> (i32, i32) {
    %c0_i32 = arith.constant 0 : i32
    return %arg0, %arg1 : i32, i32
  }
  func.func @transform_2(%arg0: i32, %arg1: i32) -> (i32, i32) {
    %c0_i32 = arith.constant 0 : i32
    %c0_i32_0 = arith.constant 0 : i32
    return %arg1, %c0_i32 : i32, i32
  }
  func.func @transform_3(%arg0: i32, %arg1: i32) -> (i32, i32) {
    %c0_i32 = arith.constant 0 : i32
    %c0_i32_0 = arith.constant 0 : i32
    %c0_i32_1 = arith.constant 0 : i32
    return %c0_i32, %c0_i32_0 : i32, i32
  }
  func.func @transform_4(%arg0: i32, %arg1: i32) -> i32 {
    %c0_i32 = arith.constant 0 : i32
    %c0_i32_0 = arith.constant 0 : i32
    return %c0_i32 : i32
  }
  func.func @transform_5(%arg0: i32, %arg1: i32) -> (i32, i32) {
    %c0_i32 = arith.constant 0 : i32
    %c0_i32_0 = arith.constant 0 : i32
    return %arg0, %c0_i32 : i32, i32
  }
}

</mosaic_0001>

<bundles_post_ra>
// kernel: tpu_custom_call.1
= control target key start
LH: loop header
LB: loop body
LE: loop exit
PB: predicated region body
PF: predicated region fallthrough
CT: control target
= control target key end

     0   :  { %11 = vsyncpa [#allocation4], 0  ;;  %s436_s0 = inlined_call_operand.hbm [shape: f32[8,128], index: 0, kind: input, shape index: {}, may-alias: {0,5}]   ;;  %s437_s1 = inlined_call_operand.vmem [shape: f32[8,128], index: 1, kind: input, shape index: {}]   ;;  %s438_s2 = inlined_call_operand.hbm [shape: f32[128,128], index: 2, kind: input, shape index: {}]   ;;  %s439_s3 = inlined_call_operand.vmem [shape: f32[1,128], index: 3, kind: input, shape index: {}]   ;;  %s440_s4 = inlined_call_operand.<no memory space> [shape: f32[1], index: 4, kind: input, shape index: {}]   ;;  %s441_s5 = inlined_call_operand.hbm [shape: f32[8,128], index: 5, kind: output, shape index: {}, may-alias: {0,5}]  }
   0x1   :  { %12 = vsyncpa [#allocation7], 0 }
   0x2   :  { %13 = vsyncpa [#allocation5], 0  ;;  %s346_s18 = smov [#allocation3]   ;;  %s347_s20 = smov [#allocation6]  }
   0x3   :  { %s20_s19 = sshll.u32 %s346_s18, 4  ;;  %s31_s21 = sshll.u32 %s347_s20, 4  ;;  %s21_s19 = int_to_ptr.vmem [resolvable:$true] %s20_s19  ;;  %s384_s21 = int_to_ptr.vmem [resolvable:$true] %s31_s21 }
   0x4   :  { %s274_s24 = scalar_lea.hbm %s436_s0, 128 }
   0x5   :  { %p275_p0 = scmp.ne.s32.totalorder %s436_s0, %s274_s24  ;;  %p278_p1 = scmp.lt.u32.totalorder %s274_s24, %s436_s0 }
   0x7   :  { %p280_p2 = pnand %p278_p1, %p275_p0 }
   0x9   :  { %283 = shalt.err (!%p280_p2)
}
   0xa   :  { %s284_s29 = scalar_lea.vmem %s21_s19, 128  ;;  %p289_p4 = scmp.lt.s32.totalorder %s21_s19, %s21_s19 }
   0xb   :  { %p285_p3 = scmp.ne.s32.totalorder %s21_s19, %s284_s29  ;;  %p290_p5 = scmp.lt.s32.totalorder %s284_s29, %s284_s29 }
   0xd   :  { %p291_p6 = por %p290_p5, %p289_p4 }
   0xf   :  { %p292_p7 = pnand %p291_p6, %p285_p3 }
  0x11   :  { %295 = shalt.err (!%p292_p7)
}
  0x12   :  { %23 = dma.hbm_to_vmem [thread:$0]  %s436_s0, 128, %s21_s19, [#allocation4]  }
  0x13   :  { %s296_s9 = scalar_lea.hbm %s438_s2, 2048 }
  0x14   :  { %p297_p8 = scmp.ne.s32.totalorder %s438_s2, %s296_s9  ;;  %p300_p9 = scmp.lt.u32.totalorder %s296_s9, %s438_s2 }
  0x16   :  { %p302_p10 = pnand %p300_p9, %p297_p8 }
  0x18   :  { %305 = shalt.err (!%p302_p10)
}
  0x19   :  { %s306_s14 = scalar_lea.vmem %s384_s21, 2048  ;;  %p311_p12 = scmp.lt.s32.totalorder %s384_s21, %s384_s21 }
  0x1a   :  { %p307_p11 = scmp.ne.s32.totalorder %s384_s21, %s306_s14  ;;  %p312_p13 = scmp.lt.s32.totalorder %s306_s14, %s306_s14 }
  0x1c   :  { %p313_p0 = por %p312_p13, %p311_p12 }
  0x1e   :  { %p314_p1 = pnand %p313_p0, %p307_p11 }
  0x20   :  { %317 = shalt.err (!%p314_p1)
}
  0x21   :  { %s348_s0 = smov 128   ;;  %s349_s15 = smov 8  }
  0x22   :  { %37 = dma.hbm_to_vmem [thread:$0]  %s438_s2, 2048, %s384_s21, [#allocation7], %s348_s0, %s348_s0, %s349_s15  }
  0x23   :  { %340 = dma.done.wait [#allocation4], 128  }
  0x24   :  { %341 = vsyncadd [#allocation4], 4294967168 }
  0x25   :  { %342 = dma.done.wait [#allocation7], 2048  }
  0x26   :  { %343 = vsyncadd [#allocation7], 4294965248  ;;  %v350_v0 = vmov 0.0|0.0   ;;  %vm351_vm0 = vmmov 0   ;;  %v352_v1 = vmov 0.0   ;;  %v49_v2 = vld [vmem:[#allocation6] sm:$0xff]  ;;  %v153_v27 = vstv %s440_s4 }
  0x27   :  { %240 = vmatprep.subr.bf16.mxu0 %v350_v0  ;;  %237 = vmatprep.mubr.msk.f32.mxu0 %vm351_vm0, %v352_v1  ;;  %v50_v3 = vld [vmem:[#allocation6 + $0x8] sm:$0xff]  ;;  %v51_v4 = vld [vmem:[#allocation6 + $0x10] sm:$0xff]  ;;  %v52_v6 = vld [vmem:[#allocation6 + $0x18] sm:$0xff] }
  0x28   :  { %v241_v5 = vpack.c.bf16 %v50_v3, %v49_v2  ;;  %v244_v7 = vpack.c.bf16 %v52_v6, %v51_v4  ;;  %v53_v8 = vld [vmem:[#allocation6 + $0x20] sm:$0xff]  ;;  %v54_v9 = vld [vmem:[#allocation6 + $0x28] sm:$0xff]  ;;  %v55_v11 = vld [vmem:[#allocation6 + $0x30] sm:$0xff] }
  0x29   :  { %v247_v10 = vpack.c.bf16 %v54_v9, %v53_v8  ;;  %v56_v12 = vld [vmem:[#allocation6 + $0x38] sm:$0xff]  ;;  %v57_v14 = vld [vmem:[#allocation6 + $0x40] sm:$0xff]  ;;  %v58_v15 = vld [vmem:[#allocation6 + $0x48] sm:$0xff] }
  0x2a   :  { %242 = vmatpush3.bf16.msra.mxu0 %v241_v5  ;;  %v250_v13 = vpack.c.bf16 %v56_v12, %v55_v11  ;;  %v253_v16 = vpack.c.bf16 %v58_v15, %v57_v14  ;;  %v59_v17 = vld [vmem:[#allocation6 + $0x50] sm:$0xff]  ;;  %v60_v18 = vld [vmem:[#allocation6 + $0x58] sm:$0xff]  ;;  %v61_v20 = vld [vmem:[#allocation6 + $0x60] sm:$0xff] }
  0x2b   :  { %243 = vmatprep.subr.bf16.mxu0 %v350_v0  ;;  %v256_v19 = vpack.c.bf16 %v60_v18, %v59_v17  ;;  %v62_v21 = vld [vmem:[#allocation6 + $0x68] sm:$0xff]  ;;  %v63_v23 = vld [vmem:[#allocation6 + $0x70] sm:$0xff]  ;;  %v64_v24 = vld [vmem:[#allocation6 + $0x78] sm:$0xff] }
  0x2c   :  { %v259_v22 = vpack.c.bf16 %v62_v21, %v61_v20  ;;  %v262_v25 = vpack.c.bf16 %v64_v24, %v63_v23  ;;  %v48_v26 = vld [vmem:[%s437_s1] sm:$0xff]  ;;  %v150_v29 = vld [vmem:[#allocation3] sm:$0xff]  ;;  %s353_s1 = smov [#allocation8]  }
  0x2d   :  { %v187_v32 = vld [vmem:[%s439_s3] ss:$0 sm:$0xff]  ;;  %s177_s23 = sshll.u32 %s353_s1, 4  ;;  %s178_s23 = int_to_ptr.vmem [resolvable:$true] %s177_s23 }
  0x2e   :  { %245 = vmatpush3.bf16.msra.mxu0 %v244_v7  ;;  %s318_s4 = scalar_lea.vmem %s178_s23, 128  ;;  %p323_p3 = scmp.lt.s32.totalorder %s178_s23, %s178_s23 }
  0x2f   :  { %246 = vmatprep.subr.bf16.mxu0 %v350_v0  ;;  %p319_p2 = scmp.ne.s32.totalorder %s178_s23, %s318_s4  ;;  %p324_p4 = scmp.lt.s32.totalorder %s318_s4, %s318_s4 }
  0x31   :  { %p325_p5 = por %p324_p4, %p323_p3 }
  0x32   :  { %248 = vmatpush3.bf16.msra.mxu0 %v247_v10 }
  0x33   :  { %249 = vmatprep.subr.bf16.mxu0 %v350_v0  ;;  %p326_p6 = pnand %p325_p5, %p319_p2 }
  0x36   :  { %251 = vmatpush3.bf16.msra.mxu0 %v250_v13 }
  0x37   :  { %252 = vmatprep.subr.bf16.mxu0 %v350_v0 }
  0x3a   :  { %254 = vmatpush3.bf16.msra.mxu0 %v253_v16 }
  0x3b   :  { %255 = vmatprep.subr.bf16.mxu0 %v350_v0 }
  0x3e   :  { %257 = vmatpush3.bf16.msra.mxu0 %v256_v19 }
  0x3f   :  { %258 = vmatprep.subr.bf16.mxu0 %v350_v0 }
  0x42   :  { %260 = vmatpush3.bf16.msra.mxu0 %v259_v22 }
  0x43   :  { %261 = vmatprep.subr.bf16.mxu0 %v350_v0 }
  0x46   :  { %263 = vmatpush3.bf16.msra.mxu0 %v262_v25 }
  0x49   :  { %238 = vmatmul.mubr.f32.vlgmr.msra.gmra.mrb[0].mxu0 %v48_v26 }
 0x11c   :  { %v131_v28 = vpop.f32.mrb[0].mxu0 }
 0x11d   :  { %v239_v30 = vpop.f32.mrb[1].mxu0  ;;  %v154_v31 = vmul.f32 %v153_v27, %v131_v28 }
 0x11f   :  { %v155_v33 = vadd.f32 %v154_v31, %v150_v29 }
 0x121   :  { %v163_v34 = vadd.f32 %v187_v32, %v155_v33 }
 0x123   :  { %v164_v35 = vmul.f32 %v163_v34, %v163_v34 }
 0x125   :  { %165 = vadd.xlane.f32.xlu0 %v164_v35 }
 0x1b2   :  { %v166_v36 = vpop.xlane.xlu0 %165 }
 0x1b3   :  { %v167_v37 = vmax.f32 %v166_v36, 1e-24 }
 0x1b5   :  { %272 = vrsqrt.f32 %v167_v37 }
 0x1bf   :  { %v273_v38 = vpop.eup %272 }
 0x1c0   :  { %v169_v39 = vmul.f32 %v273_v38, %v163_v34 }
 0x1c2   :  { %170 = vst [vmem:[#allocation8] sm:$0xff] %v169_v39 }
 0x1c3   :  { %329 = shalt.err (!%p326_p6)
}
 0x1c4   :  { %s330_s25 = scalar_lea.hbm %s441_s5, 128 }
 0x1c5   :  { %p331_p7 = scmp.ne.s32.totalorder %s441_s5, %s330_s25  ;;  %p334_p8 = scmp.lt.u32.totalorder %s330_s25, %s441_s5 }
 0x1c7   :  { %p336_p9 = pnand %p334_p8, %p331_p7 }
 0x1c9   :  { %339 = shalt.err (!%p336_p9)
}
 0x1ca   :  { %180 = dma.vmem_to_hbm [thread:$0]  %s178_s23, 128, %s441_s5, [#allocation5]  }
 0x1cb   :  { %344 = dma.done.wait [#allocation5], 128  }
 0x1cc   :  { %345 = vsyncadd [#allocation5], 4294967168 }
 0x1cd   :  { %184 = vsyncpa [#allocation4], 1 }
 0x1ce   :  { %185 = vsyncpa [#allocation7], 1 }
 0x1cf   :  { %186 = vsyncpa [#allocation5], 1 }

</bundles_post_ra>
